<compile_context>
chip_gen: v6e
topology: v6e:2x2x1
jax: 0.10.0
libtpu: 0.0.40
codegen_flags: <defaults>
</compile_context>

<pallas_src>
import math

import jax
import jax.numpy as jnp
from jax.experimental import pallas as pl
from jax.experimental.pallas import tpu as pltpu


# ----------------------------------------------------------------------------
# Kernel
# ----------------------------------------------------------------------------
def _se_layer_kernel(x_ref, w1t_ref, b1_ref, w2t_ref, b2_ref, g_ref):
    # x_ref:  (TM, D)  row tile of the flattened input (native dtype -> MXU)
    # w1t:    (D, H)   s_layer weight, transposed -> x @ W1^T
    # b1:     (1, H)   f32
    # w2t:    (H, D)   e_layer weight, transposed -> h @ W2^T
    # b2:     (1, D)   f32
    # g_ref:  (TM, D)
    x = x_ref[...]
    h = jnp.dot(x, w1t_ref[...], preferred_element_type=jnp.float32) + b1_ref[...]
    h = jnp.maximum(h, 0.0)                                    # relu, (TM, H) f32
    s = jnp.dot(h.astype(w2t_ref.dtype), w2t_ref[...],
                preferred_element_type=jnp.float32) + b2_ref[...]
    # sigmoid(s) = 0.5 * tanh(0.5 * s) + 0.5  (single EUP op, exact-ish numerics)
    g = 0.5 * jnp.tanh(0.5 * s) + 0.5                          # (TM, D) f32
    # TODO(synk): if the caller applies the gate (x * g), fuse that multiply here
    # (the x tile is already VMEM-resident) and emit x*g instead of g.
    g_ref[...] = g.astype(g_ref.dtype)


# ----------------------------------------------------------------------------
# Hardware query + tile policy
# ----------------------------------------------------------------------------
def _tpu_vmem_and_cores():
    """Best-effort (VMEM bytes per core, TensorCores per chip); safe fallbacks."""
    vmem = 64 * 1024 * 1024     # conservative default = v7x per-TC VMEM
    cores = 1
    try:
        info = pltpu.get_tpu_info()
        for attr in ("vmem_capacity_bytes", "vmem_bytes", "vmem_size_bytes"):
            v = getattr(info, attr, None)
            if isinstance(v, int) and v > 0:
                vmem = v
                break
        for attr in ("num_cores", "tensorcores_per_chip", "core_count"):
            c = getattr(info, attr, None)
            if isinstance(c, int) and c > 0:
                cores = c
                break
    except Exception:
        pass
    try:
        c = getattr(jax.devices()[0], "num_cores", None)
        if isinstance(c, int) and c > 0:
            cores = max(cores, c)
    except Exception:
        pass
    return vmem, cores


_TM_CANDIDATES = (8192, 6144, 4096, 3072, 2048, 1536, 1024, 768, 512, 384,
                  256, 192, 128, 96, 64, 48, 32, 16, 8)


def _pick_tm(M, D, H, x_bytes, out_bytes, w_bytes, vmem_cap, cores):
    """Largest row tile whose in-flight VMEM fits the budget.

    - No forced >=2 grid steps on single-TC chips (v5e/v6e): one full-M tile
      is strictly better than splitting a serial loop.
    - On multi-TC chips prefer grid lengths that are a multiple of `cores`.
    """
    per_row = 2 * D * (x_bytes + out_bytes) + 4 * (H + 2 * D)      # dbl-buf streams + f32 interm.
    weight_bytes = 2 * (2 * D * H * w_bytes + (H + D) * 4)
    budget = max(int(0.5 * vmem_cap) - weight_bytes, 8 * per_row)

    cands = [t for t in _TM_CANDIDATES if t <= M]
    single_tile = None
    for t in cands:
        if M % t != 0 or t * per_row > budget:
            continue
        steps = M // t
        if cores > 1:
            if steps == 1:
                if single_tile is None:
                    single_tile = t        # remember; keep looking for an even TC split
                continue
            if steps % cores != 0:
                continue
        return t
    if single_tile is not None:
        return single_tile
    # No exact divisor fits the budget: take the largest tile that fits; the
    # ragged last block is handled by Pallas with masked stores (correct).
    for t in cands:
        if t * per_row <= budget:
            return t
    return min(M, 8)


# ----------------------------------------------------------------------------
# Parameter prep (hoisted out of the per-forward path)
# ----------------------------------------------------------------------------
def prepare_se_params(w1, b1, w2, b2, weight_dtype=None):
    """One-time prep: transpose nn.Linear weights to (in, out), biases to f32 rows.

    w1: (H, D) s_layer weight; b1: (H,); w2: (D, H) e_layer weight; b2: (D,).
    Optionally cast the weights to `weight_dtype` (e.g. bf16, MXU-native).
    """
    w1t = jnp.transpose(w1)                  # (D, H)
    w2t = jnp.transpose(w2)                  # (H, D)
    if weight_dtype is not None:
        w1t = w1t.astype(weight_dtype)
        w2t = w2t.astype(weight_dtype)
    b1_2d = b1.reshape(1, -1).astype(jnp.float32)
    b2_2d = b2.reshape(1, -1).astype(jnp.float32)
    return w1t, b1_2d, w2t, b2_2d


# ----------------------------------------------------------------------------
# Wrapper
# ----------------------------------------------------------------------------
def se_layer_pallas(x, params, *, tm=None):
    """x: (..., D); params = prepare_se_params(w1, b1, w2, b2)."""
    w1t, b1_2d, w2t, b2_2d = params
    D, H = w1t.shape
    assert w2t.shape == (H, D)
    assert b1_2d.shape == (1, H) and b2_2d.shape == (1, D)
    assert x.shape[-1] == D

    orig_shape = x.shape
    M = math.prod(orig_shape[:-1])
    x2d = x.reshape(M, D)

    vmem_cap, cores = _tpu_vmem_and_cores()
    x_bytes = jnp.dtype(x.dtype).itemsize
    out_bytes = x_bytes
    w_bytes = jnp.dtype(w1t.dtype).itemsize

    if tm is None:
        tm = _pick_tm(M, D, H, x_bytes, out_bytes, w_bytes, vmem_cap, cores)
    grid = (pl.cdiv(M, tm),)

    # Reserve only what the kernel needs (+ slack), leaving headroom for
    # surrounding XLA fusions -- important on v7x's 64 MiB per-TC VMEM.
    stream_bytes = 2 * tm * D * (x_bytes + out_bytes)           # double-buffered x/out tiles
    weight_bytes = 2 * (2 * D * H * w_bytes + (H + D) * 4)      # resident operands
    interm_bytes = tm * (H + 2 * D) * 4                         # f32 h/s/g intermediates
    vmem_limit = int(min(vmem_cap,
                         stream_bytes + weight_bytes + interm_bytes + (16 << 20)))

    out2d = pl.pallas_call(
        _se_layer_kernel,
        out_shape=jax.ShapeDtypeStruct((M, D), x.dtype),
        grid_spec=pltpu.PrefetchScalarGridSpec(
            num_scalar_prefetch=0,
            grid=grid,
            in_specs=[
                pl.BlockSpec((tm, D), lambda i: (i, 0)),        # streamed row tile
                pl.BlockSpec((D, H), lambda i: (0, 0)),         # resident weights/biases
                pl.BlockSpec((1, H), lambda i: (0, 0)),
                pl.BlockSpec((H, D), lambda i: (0, 0)),
                pl.BlockSpec((1, D), lambda i: (0, 0)),
            ],
            out_specs=pl.BlockSpec((tm, D), lambda i: (i, 0)),
        ),
        compiler_params=pltpu.CompilerParams(
            dimension_semantics=("parallel",),
            vmem_limit_bytes=vmem_limit,
        ),
    )(x2d, w1t, b1_2d, w2t, b2_2d)

    return out2d.reshape(orig_shape)


def se_layer_reference(x, w1, b1, w2, b2):
    """Pure-JAX reference matching the PyTorch forward."""
    h = jax.nn.relu(jnp.einsum("...d,hd->...h", x, w1) + b1)
    return jax.nn.sigmoid(jnp.einsum("...h,dh->...d", h, w2) + b2)


# ----------------------------------------------------------------------------
# Demo / self-test
# ----------------------------------------------------------------------------
if __name__ == "__main__":
    B = 2          # batch
    L = 64         # sequence length (any leading dims are flattened)
    D = 256        # input_dim (multiple of 128 -> lane-dense stores)
    r = 32         # reduction ratio (module default)
    H = D // r     # hidden = 8

    key = jax.random.PRNGKey(0)
    kx, k1, k2, k3, k4 = jax.random.split(key, 5)

    x = jax.random.normal(kx, (B, L, D), dtype=jnp.float32)
    # nn.Linear layout: weight (out, in), bias (out,)
    w1 = jax.random.normal(k1, (H, D), dtype=jnp.float32) * (1.0 / jnp.sqrt(D))
    b1 = jax.random.normal(k2, (H,), dtype=jnp.float32) * 0.01
    w2 = jax.random.normal(k3, (D, H), dtype=jnp.float32) * (1.0 / jnp.sqrt(H))
    b2 = jax.random.normal(k4, (D,), dtype=jnp.float32) * 0.01

    # f32 path
    params = prepare_se_params(w1, b1, w2, b2)                 # one-time prep
    out = jax.block_until_ready(se_layer_pallas(x, params))
    ref = se_layer_reference(x, w1, b1, w2, b2)
    assert out.shape == (B, L, D)
    assert jnp.allclose(out, ref, atol=1e-3, rtol=1e-3), "f32 mismatch vs reference"

    # bf16 streamed tensors (halves HBM traffic in this mem-bound regime);
    # accumulation stays f32 inside the kernel.
    x_bf16 = x.astype(jnp.bfloat16)
    params_bf16 = prepare_se_params(w1, b1, w2, b2, weight_dtype=jnp.bfloat16)
    out_bf16 = jax.block_until_ready(se_layer_pallas(x_bf16, params_bf16))
    ref_bf16 = se_layer_reference(x_bf16.astype(jnp.float32), w1, b1, w2, b2)
    assert out_bf16.shape == (B, L, D) and out_bf16.dtype == jnp.bfloat16
    assert jnp.allclose(out_bf16.astype(jnp.float32), ref_bf16, atol=2e-2, rtol=2e-2), \
        "bf16 mismatch vs reference"

    print("KERNEL_OK")
</pallas_src>

<mosaic_0001>
module attributes {stable_mosaic.version = 11 : i64} {
  func.func @_se_layer_kernel(%arg0: i32, %arg1: memref<128x256xf32, #tpu.memory_space<vmem>>, %arg2: memref<256x8xf32, #tpu.memory_space<vmem>>, %arg3: memref<1x8xf32, #tpu.memory_space<vmem>>, %arg4: memref<8x256xf32, #tpu.memory_space<vmem>>, %arg5: memref<1x256xf32, #tpu.memory_space<vmem>>, %arg6: memref<128x256xf32, #tpu.memory_space<vmem>>) attributes {dimension_semantics = [#tpu.dimension_semantics<parallel>], iteration_bounds = array<i64: 1>, scalar_prefetch = 0 : i64, scratch_operands = 0 : i64, tpu.core_type = #tpu.core_type<tc>, window_params = [{transform_indices = @transform_0, window_bounds = array<i64: 128, 256>}, {pipeline_mode = #tpu.pipeline_mode<synchronous>, transform_indices = @transform_1, window_bounds = array<i64: 256, 8>}, {pipeline_mode = #tpu.pipeline_mode<synchronous>, transform_indices = @transform_2, window_bounds = array<i64: 1, 8>}, {pipeline_mode = #tpu.pipeline_mode<synchronous>, transform_indices = @transform_3, window_bounds = array<i64: 8, 256>}, {pipeline_mode = #tpu.pipeline_mode<synchronous>, transform_indices = @transform_4, window_bounds = array<i64: 1, 256>}, {transform_indices = @transform_5, window_bounds = array<i64: 128, 256>}]} {
    %c0 = arith.constant 0 : index
    %c0_0 = arith.constant 0 : index
    %0 = vector.load %arg1[%c0, %c0_0] : memref<128x256xf32, #tpu.memory_space<vmem>>, vector<128x256xf32>
    %c0_1 = arith.constant 0 : index
    %c0_2 = arith.constant 0 : index
    %1 = vector.load %arg2[%c0_1, %c0_2] : memref<256x8xf32, #tpu.memory_space<vmem>>, vector<256x8xf32>
    %cst = arith.constant dense<0.000000e+00> : vector<128x8xf32>
    %2 = tpu.matmul %0, %1, %cst {dimension_numbers = #tpu.dot_dimension_numbers<[1], [0], [0], [1], [0, 0, 1, 1], [], []>} : vector<128x256xf32>, vector<256x8xf32>, vector<128x8xf32> -> vector<128x8xf32>
    %c0_3 = arith.constant 0 : index
    %c0_4 = arith.constant 0 : index
    %3 = vector.load %arg3[%c0_3, %c0_4] : memref<1x8xf32, #tpu.memory_space<vmem>>, vector<1x8xf32>
    %4 = vector.broadcast %3 : vector<1x8xf32> to vector<128x8xf32>
    %5 = arith.addf %2, %4 : vector<128x8xf32>
    %cst_5 = arith.constant 0.000000e+00 : f32
    %6 = vector.broadcast %cst_5 : f32 to vector<128x8xf32>
    %7 = arith.maximumf %5, %6 : vector<128x8xf32>
    %c0_6 = arith.constant 0 : index
    %c0_7 = arith.constant 0 : index
    %8 = vector.load %arg4[%c0_6, %c0_7] : memref<8x256xf32, #tpu.memory_space<vmem>>, vector<8x256xf32>
    %cst_8 = arith.constant dense<0.000000e+00> : vector<128x256xf32>
    %9 = tpu.matmul %7, %8, %cst_8 {dimension_numbers = #tpu.dot_dimension_numbers<[1], [0], [0], [1], [0, 0, 1, 1], [], []>} : vector<128x8xf32>, vector<8x256xf32>, vector<128x256xf32> -> vector<128x256xf32>
    %c0_9 = arith.constant 0 : index
    %c0_10 = arith.constant 0 : index
    %10 = vector.load %arg5[%c0_9, %c0_10] : memref<1x256xf32, #tpu.memory_space<vmem>>, vector<1x256xf32>
    %11 = vector.broadcast %10 : vector<1x256xf32> to vector<128x256xf32>
    %12 = arith.addf %9, %11 : vector<128x256xf32>
    %cst_11 = arith.constant 5.000000e-01 : f32
    %13 = vector.broadcast %cst_11 : f32 to vector<128x256xf32>
    %14 = arith.mulf %13, %12 : vector<128x256xf32>
    %15 = math.tanh %14 : vector<128x256xf32>
    %cst_12 = arith.constant 5.000000e-01 : f32
    %16 = vector.broadcast %cst_12 : f32 to vector<128x256xf32>
    %17 = arith.mulf %16, %15 : vector<128x256xf32>
    %cst_13 = arith.constant 5.000000e-01 : f32
    %18 = vector.broadcast %cst_13 : f32 to vector<128x256xf32>
    %19 = arith.addf %17, %18 : vector<128x256xf32>
    %c0_14 = arith.constant 0 : index
    %c0_15 = arith.constant 0 : index
    %20 = vector.load %arg6[%c0_14, %c0_15] : memref<128x256xf32, #tpu.memory_space<vmem>>, vector<128x256xf32>
    tpu.vector_store %arg6[%c0_14, %c0_15], %19 {strides = array<i32>} : memref<128x256xf32, #tpu.memory_space<vmem>>, vector<128x256xf32>,
    return
  }
  func.func @transform_0(%arg0: i32) -> (i32, i32) {
    %c0_i32 = arith.constant 0 : i32
    %c0_i32_0 = arith.constant 0 : i32
    return %arg0, %c0_i32 : i32, i32
  }
  func.func @transform_1(%arg0: i32) -> (i32, i32) {
    %c0_i32 = arith.constant 0 : i32
    %c0_i32_0 = arith.constant 0 : i32
    %c0_i32_1 = arith.constant 0 : i32
    return %c0_i32, %c0_i32_0 : i32, i32
  }
  func.func @transform_2(%arg0: i32) -> (i32, i32) {
    %c0_i32 = arith.constant 0 : i32
    %c0_i32_0 = arith.constant 0 : i32
    %c0_i32_1 = arith.constant 0 : i32
    return %c0_i32, %c0_i32_0 : i32, i32
  }
  func.func @transform_3(%arg0: i32) -> (i32, i32) {
    %c0_i32 = arith.constant 0 : i32
    %c0_i32_0 = arith.constant 0 : i32
    %c0_i32_1 = arith.constant 0 : i32
    return %c0_i32, %c0_i32_0 : i32, i32
  }
  func.func @transform_4(%arg0: i32) -> (i32, i32) {
    %c0_i32 = arith.constant 0 : i32
    %c0_i32_0 = arith.constant 0 : i32
    %c0_i32_1 = arith.constant 0 : i32
    return %c0_i32, %c0_i32_0 : i32, i32
  }
  func.func @transform_5(%arg0: i32) -> (i32, i32) {
    %c0_i32 = arith.constant 0 : i32
    %c0_i32_0 = arith.constant 0 : i32
    return %arg0, %c0_i32 : i32, i32
  }
}

</mosaic_0001>

<bundles_post_ra>
// kernel: tpu_custom_call.1
= control target key start
LH: loop header
LB: loop body
LE: loop exit
PB: predicated region body
PF: predicated region fallthrough
CT: control target
= control target key end

     0   :  { %s1167_s0 = inlined_call_operand.vmem [shape: f32[128,256], index: 0, kind: input, shape index: {}]   ;;  %s1168_s1 = inlined_call_operand.vmem [shape: f32[256,8], index: 1, kind: input, shape index: {}]   ;;  %s1169_s2 = inlined_call_operand.vmem [shape: f32[1,8], index: 2, kind: input, shape index: {}]   ;;  %s1170_s3 = inlined_call_operand.vmem [shape: f32[8,256], index: 3, kind: input, shape index: {}]   ;;  %s1171_s4 = inlined_call_operand.vmem [shape: f32[1,256], index: 4, kind: input, shape index: {}]   ;;  %s1172_s5 = inlined_call_operand.hbm [shape: f32[128,256], index: 5, kind: output, shape index: {}]  }
   0x1   :  { %v84_v0 = vld [vmem:[%s1168_s1 + $0xf8] sm:$0xff]  ;;  %v83_v2 = vld [vmem:[%s1168_s1 + $0xf0] sm:$0xff]  ;;  %v82_v4 = vld [vmem:[%s1168_s1 + $0xe8] sm:$0xff] }
   0x2   :  { %v68_v1 = vld [vmem:[%s1168_s1 + $0x78] sm:$0xff]  ;;  %670 = vmatprep.subr.mxu0 %v84_v0  ;;  %v67_v3 = vld [vmem:[%s1168_s1 + $0x70] sm:$0xff]  ;;  %v66_v5 = vld [vmem:[%s1168_s1 + $0x68] sm:$0xff] }
   0x3   :  { %671 = vmatpush3.msra.mxu0 %v68_v1  ;;  %v81_v6 = vld [vmem:[%s1168_s1 + $0xe0] sm:$0xff]  ;;  %v80_v8 = vld [vmem:[%s1168_s1 + $0xd8] sm:$0xff]  ;;  %v79_v10 = vld [vmem:[%s1168_s1 + $0xd0] sm:$0xff] }
   0x4   :  { %672 = vmatprep.subr.mxu0 %v83_v2  ;;  %v65_v7 = vld [vmem:[%s1168_s1 + $0x60] sm:$0xff]  ;;  %v64_v9 = vld [vmem:[%s1168_s1 + $0x58] sm:$0xff]  ;;  %v63_v11 = vld [vmem:[%s1168_s1 + $0x50] sm:$0xff] }
   0x5   :  { %673 = vmatpush3.msra.mxu0 %v67_v3  ;;  %v78_v12 = vld [vmem:[%s1168_s1 + $0xc8] sm:$0xff]  ;;  %v77_v15 = vld [vmem:[%s1168_s1 + $0xc0] sm:$0xff]  ;;  %v76_v17 = vld [vmem:[%s1168_s1 + $0xb8] sm:$0xff] }
   0x6   :  { %674 = vmatprep.subr.mxu0 %v82_v4  ;;  %v22_v13 = vld [vmem:[%s1167_s0 + $0x8] sm:$0xff]  ;;  %v61_v16 = vld [vmem:[%s1168_s1 + $0x40] sm:$0xff]  ;;  %v60_v18 = vld [vmem:[%s1168_s1 + $0x38] sm:$0xff] }
   0x7   :  { %675 = vmatpush3.msra.mxu0 %v66_v5  ;;  %v62_v14 = vld [vmem:[%s1168_s1 + $0x48] sm:$0xff]  ;;  %156 = vmatprep.mubr.f32.mxu0 %v22_v13  ;;  %v75_v19 = vld [vmem:[%s1168_s1 + $0xb0] sm:$0xff]  ;;  %v73_v23 = vld [vmem:[%s1168_s1 + $0xa0] sm:$0xff] }
   0x8   :  { %676 = vmatprep.subr.mxu0 %v81_v6  ;;  %v59_v20 = vld [vmem:[%s1168_s1 + $0x30] sm:$0xff]  ;;  %v74_v21 = vld [vmem:[%s1168_s1 + $0xa8] sm:$0xff]  ;;  %v57_v24 = vld [vmem:[%s1168_s1 + $0x20] sm:$0xff] }
   0x9   :  { %677 = vmatpush3.msra.mxu0 %v65_v7  ;;  %v58_v22 = vld [vmem:[%s1168_s1 + $0x28] sm:$0xff] }
   0xa   :  { %678 = vmatprep.subr.mxu0 %v80_v8 }
   0xb   :  { %679 = vmatpush3.msra.mxu0 %v64_v9 }
   0xc   :  { %680 = vmatprep.subr.mxu0 %v79_v10 }
   0xd   :  { %681 = vmatpush3.msra.mxu0 %v63_v11 }
   0xe   :  { %682 = vmatprep.subr.mxu0 %v78_v12 }
   0xf   :  { %683 = vmatpush3.msra.mxu0 %v62_v14 }
  0x10   :  { %684 = vmatprep.subr.mxu0 %v77_v15 }
  0x11   :  { %685 = vmatpush3.msra.mxu0 %v61_v16 }
  0x12   :  { %686 = vmatprep.subr.mxu0 %v76_v17 }
  0x13   :  { %687 = vmatpush3.msra.mxu0 %v60_v18 }
  0x14   :  { %688 = vmatprep.subr.mxu0 %v75_v19 }
  0x15   :  { %689 = vmatpush3.msra.mxu0 %v59_v20 }
  0x16   :  { %690 = vmatprep.subr.mxu0 %v74_v21 }
  0x17   :  { %10 = vsyncpa [#allocation3], 0  ;;  %691 = vmatpush3.msra.mxu0 %v58_v22  ;;  %v72_v25 = vld [vmem:[%s1168_s1 + $0x98] sm:$0xff]  ;;  %v71_v27 = vld [vmem:[%s1168_s1 + $0x90] sm:$0xff]  ;;  %v840_v2 = vmov 0.0   ;;  %vm267_vm0 = vcmask 64512  }
  0x18   :  { %692 = vmatprep.subr.mxu0 %v73_v23  ;;  %v56_v26 = vld [vmem:[%s1168_s1 + $0x18] sm:$0xff]  ;;  %v55_v28 = vld [vmem:[%s1168_s1 + $0x10] sm:$0xff]  ;;  %v70_v29 = vld [vmem:[%s1168_s1 + $0x88] sm:$0xff]  ;;  %380 = vmatprep.mubr.f32.mxu1 %v840_v2 }
  0x19   :  { %693 = vmatpush3.msra.mxu0 %v57_v24  ;;  %v54_v30 = vld [vmem:[%s1168_s1 + $0x8] sm:$0xff]  ;;  %v69_v31 = vld [vmem:[%s1168_s1 + $0x80] sm:$0xff]  ;;  %v24_v34 = vld [vmem:[%s1167_s0 + $0x18] sm:$0xff] }
  0x1a   :  { %694 = vmatprep.subr.mxu0 %v72_v25  ;;  %v53_v32 = vld [vmem:[%s1168_s1] sm:$0xff]  ;;  %v23_v35 = vld [vmem:[%s1167_s0 + $0x10] sm:$0xff]  ;;  %v26_v36 = vld [vmem:[%s1167_s0 + $0x28] sm:$0xff] }
  0x1b   :  { %695 = vmatpush3.msra.mxu0 %v56_v26  ;;  %v21_v33 = vld [vmem:[%s1167_s0] sm:$0xff]  ;;  %v28_v38 = vld [vmem:[%s1167_s0 + $0x38] sm:$0xff]  ;;  %v27_v39 = vld [vmem:[%s1167_s0 + $0x30] sm:$0xff] }
  0x1c   :  { %696 = vmatprep.subr.mxu0 %v71_v27  ;;  %v25_v37 = vld [vmem:[%s1167_s0 + $0x20] sm:$0xff]  ;;  %v30_v40 = vld [vmem:[%s1167_s0 + $0x48] sm:$0xff]  ;;  %v32_v42 = vld [vmem:[%s1167_s0 + $0x58] sm:$0xff] }
  0x1d   :  { %697 = vmatpush3.msra.mxu0 %v55_v28  ;;  %v29_v41 = vld [vmem:[%s1167_s0 + $0x40] sm:$0xff]  ;;  %v31_v43 = vld [vmem:[%s1167_s0 + $0x50] sm:$0xff]  ;;  %v34_v44 = vld [vmem:[%s1167_s0 + $0x68] sm:$0xff] }
  0x1e   :  { %698 = vmatprep.subr.mxu0 %v70_v29  ;;  %v33_v45 = vld [vmem:[%s1167_s0 + $0x60] sm:$0xff]  ;;  %v36_v46 = vld [vmem:[%s1167_s0 + $0x78] sm:$0xff]  ;;  %v35_v47 = vld [vmem:[%s1167_s0 + $0x70] sm:$0xff] }
  0x1f   :  { %699 = vmatpush3.msra.mxu0 %v54_v30  ;;  %v38_v48 = vld [vmem:[%s1167_s0 + $0x88] sm:$0xff]  ;;  %v37_v49 = vld [vmem:[%s1167_s0 + $0x80] sm:$0xff]  ;;  %v40_v50 = vld [vmem:[%s1167_s0 + $0x98] sm:$0xff] }
  0x20   :  { %700 = vmatprep.subr.mxu0 %v69_v31  ;;  %v39_v51 = vld [vmem:[%s1167_s0 + $0x90] sm:$0xff]  ;;  %v42_v52 = vld [vmem:[%s1167_s0 + $0xa8] sm:$0xff]  ;;  %v41_v53 = vld [vmem:[%s1167_s0 + $0xa0] sm:$0xff] }
  0x21   :  { %701 = vmatpush3.msra.mxu0 %v53_v32  ;;  %v44_v54 = vld [vmem:[%s1167_s0 + $0xb8] sm:$0xff]  ;;  %v43_v55 = vld [vmem:[%s1167_s0 + $0xb0] sm:$0xff]  ;;  %v46_v56 = vld [vmem:[%s1167_s0 + $0xc8] sm:$0xff] }
  0x22   :  { %157 = vmatmul.mubr.f32.vlgmr.msra.gmra.mxu0 %v21_v33  ;;  %v45_v57 = vld [vmem:[%s1167_s0 + $0xc0] sm:$0xff]  ;;  %v48_v58 = vld [vmem:[%s1167_s0 + $0xd8] sm:$0xff]  ;;  %v47_v59 = vld [vmem:[%s1167_s0 + $0xd0] sm:$0xff] }
  0x23   :  { %161 = vmatprep.mubr.f32.mxu0 %v24_v34  ;;  %v50_v60 = vld [vmem:[%s1167_s0 + $0xe8] sm:$0xff]  ;;  %v49_v61 = vld [vmem:[%s1167_s0 + $0xe0] sm:$0xff]  ;;  %v52_v62 = vld [vmem:[%s1167_s0 + $0xf8] sm:$0xff] }
  0x24   :  { %v51_v63 = vld [vmem:[%s1167_s0 + $0xf0] sm:$0xff]  ;;  %v254_v0 = vld [vmem:[%s1170_s3 + $0x8] sm:$0xff]  ;;  %v253_v1 = vld [vmem:[%s1170_s3] sm:$0xff]  ;;  %s841_s3 = smov [#allocation2]  }
  0x25   :  { %346 = vmatprep.subr.mxu1 %v254_v0  ;;  %v1076_v4 = vld [vmem:[%s1169_s2] ss:$0 sm:$0xff] }
  0x26   :  { %162 = vmatmul.mubr.f32.gmra.mxu0 %v23_v35  ;;  %347 = vmatpush1.msra.mxu1 %v253_v1 }
  0x27   :  { %166 = vmatprep.mubr.f32.mxu0 %v26_v36 }
  0x2a   :  { %167 = vmatmul.mubr.f32.gmra.mxu0 %v25_v37 }
  0x2b   :  { %171 = vmatprep.mubr.f32.mxu0 %v28_v38 }
  0x2e   :  { %172 = vmatmul.mubr.f32.gmra.mxu0 %v27_v39 }
  0x2f   :  { %176 = vmatprep.mubr.f32.mxu0 %v30_v40 }
  0x32   :  { %177 = vmatmul.mubr.f32.gmra.mxu0 %v29_v41 }
  0x33   :  { %181 = vmatprep.mubr.f32.mxu0 %v32_v42 }
  0x36   :  { %182 = vmatmul.mubr.f32.gmra.mxu0 %v31_v43 }
  0x37   :  { %186 = vmatprep.mubr.f32.mxu0 %v34_v44 }
  0x3a   :  { %187 = vmatmul.mubr.f32.gmra.mxu0 %v33_v45 }
  0x3b   :  { %191 = vmatprep.mubr.f32.mxu0 %v36_v46 }
  0x3e   :  { %192 = vmatmul.mubr.f32.gmra.mxu0 %v35_v47 }
  0x3f   :  { %196 = vmatprep.mubr.f32.mxu0 %v38_v48 }
  0x42   :  { %197 = vmatmul.mubr.f32.gmra.mxu0 %v37_v49 }
  0x43   :  { %201 = vmatprep.mubr.f32.mxu0 %v40_v50 }
  0x46   :  { %202 = vmatmul.mubr.f32.gmra.mxu0 %v39_v51 }
  0x47   :  { %206 = vmatprep.mubr.f32.mxu0 %v42_v52 }
  0x4a   :  { %207 = vmatmul.mubr.f32.gmra.mxu0 %v41_v53 }
  0x4b   :  { %211 = vmatprep.mubr.f32.mxu0 %v44_v54 }
  0x4e   :  { %212 = vmatmul.mubr.f32.gmra.mxu0 %v43_v55 }
  0x4f   :  { %216 = vmatprep.mubr.f32.mxu0 %v46_v56 }
  0x52   :  { %217 = vmatmul.mubr.f32.gmra.mxu0 %v45_v57 }
  0x53   :  { %221 = vmatprep.mubr.f32.mxu0 %v48_v58 }
  0x56   :  { %222 = vmatmul.mubr.f32.gmra.mxu0 %v47_v59 }
  0x57   :  { %226 = vmatprep.mubr.f32.mxu0 %v50_v60 }
  0x5a   :  { %227 = vmatmul.mubr.f32.gmra.mxu0 %v49_v61 }
  0x5b   :  { %231 = vmatprep.mubr.f32.mxu0 %v52_v62 }
  0x5e   :  { %232 = vmatmul.mubr.f32.gmra.mxu0 %v51_v63 }
  0xe2   :  { %v702_v3 = vpop.f32.mrf.mxu0 }
  0xe4   :  { %v703_v5 = vpop.f32.mrf.mxu0 }
  0xe5   :  { %v704_v6 = vadd.f32 %v703_v5, %v702_v3 }
  0xe6   :  { %v705_v7 = vpop.f32.mrf.mxu0 }
  0xe7   :  { %v159_v8 = vadd.f32 %v704_v6, %v1076_v4 }
  0xe8   :  { %v706_v9 = vpop.f32.mrf.mxu0 }
  0xe9   :  { %v237_v10 = vmax.f32 %v159_v8, 0.0  ;;  %v707_v11 = vadd.f32 %v706_v9, %v705_v7 }
  0xea   :  { %v708_v12 = vpop.f32.mrf.mxu0 }
  0xeb   :  { %v164_v13 = vadd.f32 %v707_v11, %v1076_v4  ;;  %654 = vmatmul.mubr.msk.f32.vlgmr.msra.gmra.mxu1 %vm267_vm0, %v237_v10 }
  0xec   :  { %v709_v14 = vpop.f32.mrf.mxu0  ;;  %386 = vmatprep.mubr.f32.mxu1 %v840_v2 }
  0xed   :  { %v238_v15 = vmax.f32 %v164_v13, 0.0  ;;  %v710_v16 = vadd.f32 %v709_v14, %v708_v12 }
  0xee   :  { %v711_v17 = vpop.f32.mrf.mxu0 }
  0xef   :  { %v169_v18 = vadd.f32 %v710_v16, %v1076_v4  ;;  %655 = vmatmul.mubr.msk.f32.gmra.mxu1 %vm267_vm0, %v238_v15 }
  0xf0   :  { %v712_v19 = vpop.f32.mrf.mxu0  ;;  %392 = vmatprep.mubr.f32.mxu1 %v840_v2 }
  0xf1   :  { %v239_v20 = vmax.f32 %v169_v18, 0.0  ;;  %v713_v21 = vadd.f32 %v712_v19, %v711_v17 }
  0xf2   :  { %v714_v22 = vpop.f32.mrf.mxu0 }
  0xf3   :  { %v174_v23 = vadd.f32 %v713_v21, %v1076_v4  ;;  %656 = vmatmul.mubr.msk.f32.gmra.mxu1 %vm267_vm0, %v239_v20 }
  0xf4   :  { %v715_v24 = vpop.f32.mrf.mxu0  ;;  %398 = vmatprep.mubr.f32.mxu1 %v840_v2 }
  0xf5   :  { %v240_v25 = vmax.f32 %v174_v23, 0.0  ;;  %v716_v26 = vadd.f32 %v715_v24, %v714_v22  ;;  %v257_v22 = vlaneseq }
  0xf6   :  { %v717_v27 = vpop.f32.mrf.mxu0 }
  0xf7   :  { %v179_v28 = vadd.f32 %v716_v26, %v1076_v4  ;;  %657 = vmatmul.mubr.msk.f32.gmra.mxu1 %vm267_vm0, %v240_v25  ;;  %v258_v23 = vshrl.u32 %v257_v22, 7  ;;  %v255_v25 = vld [vmem:[%s1171_s4] sm:$0x3]  ;;  %s642_s4 = sshll.u32 %s841_s3, 4  ;;  %s643_s4 = int_to_ptr.vmem [resolvable:$true] %s642_s4 }
  0xf8   :  { %v718_v29 = vpop.f32.mrf.mxu0  ;;  %404 = vmatprep.mubr.f32.mxu1 %v840_v2  ;;  %s818_s24 = scalar_lea.vmem %s643_s4, 4096  ;;  %p823_p1 = scmp.lt.s32.totalorder %s643_s4, %s643_s4 }
  0xf9   :  { %v241_v30 = vmax.f32 %v179_v28, 0.0  ;;  %v719_v31 = vadd.f32 %v718_v29, %v717_v27  ;;  %v259_v24 = vsub.s32 0, %v258_v23  ;;  %v263_v26 = vsub.s32 1, %v258_v23  ;;  %p819_p0 = scmp.ne.s32.totalorder %s643_s4, %s818_s24  ;;  %p824_p2 = scmp.lt.s32.totalorder %s818_s24, %s818_s24 }
  0xfa   :  { %v720_v32 = vpop.f32.mrf.mxu0 }
  0xfb   :  { %v184_v33 = vadd.f32 %v719_v31, %v1076_v4  ;;  %658 = vmatmul.mubr.msk.f32.gmra.mxu1 %vm267_vm0, %v241_v30  ;;  %v1128_v27 = vrot.slane %v255_v25, %v259_v24  ;;  %v1130_v28 = vrot.slane %v255_v25, %v263_v26  ;;  %p825_p3 = por %p824_p2, %p823_p1 }
  0xfc   :  { %v721_v34 = vpop.f32.mrf.mxu0  ;;  %410 = vmatprep.mubr.f32.mxu1 %v840_v2 }
  0xfd   :  { %v242_v35 = vmax.f32 %v184_v33, 0.0  ;;  %v722_v36 = vadd.f32 %v721_v34, %v720_v32  ;;  %p826_p4 = pnand %p825_p3, %p819_p0 }
  0xfe   :  { %v723_v37 = vpop.f32.mrf.mxu0 }
  0xff   :  { %v189_v38 = vadd.f32 %v722_v36, %v1076_v4  ;;  %659 = vmatmul.mubr.msk.f32.gmra.mxu1 %vm267_vm0, %v242_v35 }
 0x100   :  { %v724_v39 = vpop.f32.mrf.mxu0  ;;  %416 = vmatprep.mubr.f32.mxu1 %v840_v2 }
 0x101   :  { %v243_v40 = vmax.f32 %v189_v38, 0.0  ;;  %v725_v41 = vadd.f32 %v724_v39, %v723_v37 }
 0x102   :  { %v726_v42 = vpop.f32.mrf.mxu0 }
 0x103   :  { %v194_v43 = vadd.f32 %v725_v41, %v1076_v4  ;;  %660 = vmatmul.mubr.msk.f32.gmra.mxu1 %vm267_vm0, %v243_v40 }
 0x104   :  { %v727_v44 = vpop.f32.mrf.mxu0  ;;  %422 = vmatprep.mubr.f32.mxu1 %v840_v2 }
 0x105   :  { %v244_v45 = vmax.f32 %v194_v43, 0.0  ;;  %v728_v46 = vadd.f32 %v727_v44, %v726_v42 }
 0x106   :  { %v729_v47 = vpop.f32.mrf.mxu0 }
 0x107   :  { %v199_v48 = vadd.f32 %v728_v46, %v1076_v4  ;;  %661 = vmatmul.mubr.msk.f32.gmra.mxu1 %vm267_vm0, %v244_v45 }
 0x108   :  { %v730_v49 = vpop.f32.mrf.mxu0  ;;  %428 = vmatprep.mubr.f32.mxu1 %v840_v2 }
 0x109   :  { %v245_v50 = vmax.f32 %v199_v48, 0.0  ;;  %v731_v51 = vadd.f32 %v730_v49, %v729_v47 }
 0x10a   :  { %v732_v52 = vpop.f32.mrf.mxu0 }
 0x10b   :  { %v204_v53 = vadd.f32 %v731_v51, %v1076_v4  ;;  %662 = vmatmul.mubr.msk.f32.gmra.mxu1 %vm267_vm0, %v245_v50 }
 0x10c   :  { %v733_v54 = vpop.f32.mrf.mxu0  ;;  %434 = vmatprep.mubr.f32.mxu1 %v840_v2 }
 0x10d   :  { %v246_v55 = vmax.f32 %v204_v53, 0.0  ;;  %v734_v56 = vadd.f32 %v733_v54, %v732_v52 }
 0x10e   :  { %v735_v57 = vpop.f32.mrf.mxu0 }
 0x10f   :  { %v209_v58 = vadd.f32 %v734_v56, %v1076_v4  ;;  %663 = vmatmul.mubr.msk.f32.gmra.mxu1 %vm267_vm0, %v246_v55 }
 0x110   :  { %v736_v59 = vpop.f32.mrf.mxu0  ;;  %440 = vmatprep.mubr.f32.mxu1 %v840_v2 }
 0x111   :  { %v247_v60 = vmax.f32 %v209_v58, 0.0  ;;  %v737_v61 = vadd.f32 %v736_v59, %v735_v57 }
 0x112   :  { %v738_v62 = vpop.f32.mrf.mxu0 }
 0x113   :  { %v214_v63 = vadd.f32 %v737_v61, %v1076_v4  ;;  %664 = vmatmul.mubr.msk.f32.gmra.mxu1 %vm267_vm0, %v247_v60 }
 0x114   :  { %v739_v0 = vpop.f32.mrf.mxu0  ;;  %446 = vmatprep.mubr.f32.mxu1 %v840_v2 }
 0x115   :  { %v248_v1 = vmax.f32 %v214_v63, 0.0  ;;  %v740_v3 = vadd.f32 %v739_v0, %v738_v62 }
 0x116   :  { %v741_v5 = vpop.f32.mrf.mxu0 }
 0x117   :  { %v219_v6 = vadd.f32 %v740_v3, %v1076_v4  ;;  %665 = vmatmul.mubr.msk.f32.gmra.mxu1 %vm267_vm0, %v248_v1 }
 0x118   :  { %v742_v7 = vpop.f32.mrf.mxu0  ;;  %452 = vmatprep.mubr.f32.mxu1 %v840_v2 }
 0x119   :  { %v249_v8 = vmax.f32 %v219_v6, 0.0  ;;  %v743_v9 = vadd.f32 %v742_v7, %v741_v5 }
 0x11a   :  { %v744_v10 = vpop.f32.mrf.mxu0 }
 0x11b   :  { %v224_v11 = vadd.f32 %v743_v9, %v1076_v4  ;;  %666 = vmatmul.mubr.msk.f32.gmra.mxu1 %vm267_vm0, %v249_v8 }
 0x11c   :  { %v745_v12 = vpop.f32.mrf.mxu0  ;;  %458 = vmatprep.mubr.f32.mxu1 %v840_v2 }
 0x11d   :  { %v250_v13 = vmax.f32 %v224_v11, 0.0  ;;  %v746_v14 = vadd.f32 %v745_v12, %v744_v10 }
 0x11e   :  { %v747_v15 = vpop.f32.mrf.mxu0 }
 0x11f   :  { %v229_v16 = vadd.f32 %v746_v14, %v1076_v4  ;;  %667 = vmatmul.mubr.msk.f32.gmra.mxu1 %vm267_vm0, %v250_v13 }
 0x120   :  { %v748_v17 = vpop.f32.mrf.mxu0  ;;  %464 = vmatprep.mubr.f32.mxu1 %v840_v2 }
 0x121   :  { %v251_v18 = vmax.f32 %v229_v16, 0.0  ;;  %v749_v19 = vadd.f32 %v748_v17, %v747_v15 }
 0x123   :  { %v234_v20 = vadd.f32 %v749_v19, %v1076_v4  ;;  %668 = vmatmul.mubr.msk.f32.gmra.mxu1 %vm267_vm0, %v251_v18 }
 0x124   :  { %470 = vmatprep.mubr.f32.mxu1 %v840_v2 }
 0x125   :  { %v252_v21 = vmax.f32 %v234_v20, 0.0 }
 0x127   :  { %669 = vmatmul.mubr.msk.f32.gmra.mxu1 %vm267_vm0, %v252_v21 }
 0x1ab   :  { %v382_v4 = vpop.f32.mrf.mxu1 }
 0x1ac   :  { %v383_v29 = vadd.f32 %v382_v4, %v1128_v27 }
 0x1ad   :  { %v384_v30 = vpop.f32.mrf.mxu1 }
 0x1ae   :  { %v477_v2 = vmul.f32 0.5, %v383_v29  ;;  %v385_v31 = vadd.f32 %v384_v30, %v1130_v28 }
 0x1af   :  { %v388_v32 = vpop.f32.mrf.mxu1 }
 0x1b0   :  { %754 = vtanh.f32 %v477_v2  ;;  %v478_v33 = vmul.f32 0.5, %v385_v31  ;;  %v389_v34 = vadd.f32 %v388_v32, %v1128_v27 }
 0x1b1   :  { %v390_v35 = vpop.f32.mrf.mxu1 }
 0x1b2   :  { %756 = vtanh.f32 %v478_v33  ;;  %v479_v36 = vmul.f32 0.5, %v389_v34  ;;  %v391_v37 = vadd.f32 %v390_v35, %v1130_v28 }
 0x1b3   :  { %v394_v38 = vpop.f32.mrf.mxu1 }
 0x1b4   :  { %758 = vtanh.f32 %v479_v36  ;;  %v480_v39 = vmul.f32 0.5, %v391_v37  ;;  %v395_v40 = vadd.f32 %v394_v38, %v1128_v27 }
 0x1b5   :  { %v396_v41 = vpop.f32.mrf.mxu1 }
 0x1b6   :  { %760 = vtanh.f32 %v480_v39  ;;  %v481_v42 = vmul.f32 0.5, %v395_v40  ;;  %v397_v43 = vadd.f32 %v396_v41, %v1130_v28 }
 0x1b7   :  { %v400_v44 = vpop.f32.mrf.mxu1 }
 0x1b8   :  { %762 = vtanh.f32 %v481_v42  ;;  %v482_v45 = vmul.f32 0.5, %v397_v43  ;;  %v401_v46 = vadd.f32 %v400_v44, %v1128_v27 }
 0x1b9   :  { %v402_v47 = vpop.f32.mrf.mxu1 }
 0x1ba   :  { %764 = vtanh.f32 %v482_v45  ;;  %v483_v48 = vmul.f32 0.5, %v401_v46  ;;  %v403_v49 = vadd.f32 %v402_v47, %v1130_v28 }
 0x1bb   :  { %v406_v50 = vpop.f32.mrf.mxu1 }
 0x1bc   :  { %766 = vtanh.f32 %v483_v48  ;;  %v484_v51 = vmul.f32 0.5, %v403_v49  ;;  %v407_v52 = vadd.f32 %v406_v50, %v1128_v27 }
 0x1bd   :  { %v755_v53 = vpop.eup %754  ;;  %v408_v54 = vpop.f32.mrf.mxu1 }
 0x1be   :  { %v541_v55 = vmul.f32 0.5, %v755_v53  ;;  %768 = vtanh.f32 %v484_v51  ;;  %v485_v56 = vmul.f32 0.5, %v407_v52  ;;  %v409_v57 = vadd.f32 %v408_v54, %v1130_v28 }
 0x1bf   :  { %v757_v58 = vpop.eup %756  ;;  %v412_v59 = vpop.f32.mrf.mxu1 }
 0x1c0   :  { %v573_v60 = vadd.f32 0.5, %v541_v55  ;;  %v542_v61 = vmul.f32 0.5, %v757_v58  ;;  %770 = vtanh.f32 %v485_v56  ;;  %v486_v62 = vmul.f32 0.5, %v409_v57 }
 0x1c1   :  { %v759_v63 = vpop.eup %758  ;;  %v413_v0 = vadd.f32 %v412_v59, %v1128_v27  ;;  %v414_v1 = vpop.f32.mrf.mxu1 }
 0x1c2   :  { %605 = vst [vmem:[#allocation2] sm:$0xff] %v573_v60  ;;  %v574_v3 = vadd.f32 0.5, %v542_v61  ;;  %v543_v5 = vmul.f32 0.5, %v759_v63  ;;  %772 = vtanh.f32 %v486_v62  ;;  %v415_v6 = vadd.f32 %v414_v1, %v1130_v28 }
 0x1c3   :  { %v761_v7 = vpop.eup %760  ;;  %v487_v8 = vmul.f32 0.5, %v413_v0  ;;  %v418_v9 = vpop.f32.mrf.mxu1 }
 0x1c4   :  { %606 = vst [vmem:[#allocation2 + $0x8] sm:$0xff] %v574_v3  ;;  %v575_v10 = vadd.f32 0.5, %v543_v5  ;;  %v544_v11 = vmul.f32 0.5, %v761_v7  ;;  %v488_v12 = vmul.f32 0.5, %v415_v6  ;;  %v419_v13 = vadd.f32 %v418_v9, %v1128_v27 }
 0x1c5   :  { %v763_v14 = vpop.eup %762  ;;  %774 = vtanh.f32 %v487_v8  ;;  %v420_v15 = vpop.f32.mrf.mxu1 }
 0x1c6   :  { %607 = vst [vmem:[#allocation2 + $0x10] sm:$0xff] %v575_v10  ;;  %v576_v16 = vadd.f32 0.5, %v544_v11  ;;  %v545_v17 = vmul.f32 0.5, %v763_v14  ;;  %776 = vtanh.f32 %v488_v12  ;;  %v489_v18 = vmul.f32 0.5, %v419_v13 }
 0x1c7   :  { %v765_v19 = vpop.eup %764  ;;  %v421_v20 = vadd.f32 %v420_v15, %v1130_v28  ;;  %v424_v21 = vpop.f32.mrf.mxu1 }
 0x1c8   :  { %608 = vst [vmem:[#allocation2 + $0x18] sm:$0xff] %v576_v16  ;;  %v577_v22 = vadd.f32 0.5, %v545_v17  ;;  %v546_v23 = vmul.f32 0.5, %v765_v19  ;;  %778 = vtanh.f32 %v489_v18  ;;  %v425_v24 = vadd.f32 %v424_v21, %v1128_v27 }
 0x1c9   :  { %v767_v25 = vpop.eup %766  ;;  %v490_v26 = vmul.f32 0.5, %v421_v20  ;;  %v426_v4 = vpop.f32.mrf.mxu1 }
 0x1ca   :  { %609 = vst [vmem:[#allocation2 + $0x20] sm:$0xff] %v577_v22  ;;  %v578_v29 = vadd.f32 0.5, %v546_v23  ;;  %v547_v30 = vmul.f32 0.5, %v767_v25  ;;  %v491_v2 = vmul.f32 0.5, %v425_v24  ;;  %v427_v31 = vadd.f32 %v426_v4, %v1130_v28 }
 0x1cb   :  { %v769_v32 = vpop.eup %768  ;;  %780 = vtanh.f32 %v490_v26  ;;  %v430_v33 = vpop.f32.mrf.mxu1 }
 0x1cc   :  { %610 = vst [vmem:[#allocation2 + $0x28] sm:$0xff] %v578_v29  ;;  %v579_v34 = vadd.f32 0.5, %v547_v30  ;;  %v548_v35 = vmul.f32 0.5, %v769_v32  ;;  %782 = vtanh.f32 %v491_v2  ;;  %v492_v36 = vmul.f32 0.5, %v427_v31 }
 0x1cd   :  { %v771_v37 = vpop.eup %770  ;;  %v431_v38 = vadd.f32 %v430_v33, %v1128_v27  ;;  %v432_v39 = vpop.f32.mrf.mxu1 }
 0x1ce   :  { %611 = vst [vmem:[#allocation2 + $0x30] sm:$0xff] %v579_v34  ;;  %v580_v40 = vadd.f32 0.5, %v548_v35  ;;  %v549_v41 = vmul.f32 0.5, %v771_v37  ;;  %784 = vtanh.f32 %v492_v36  ;;  %v433_v42 = vadd.f32 %v432_v39, %v1130_v28 }
 0x1cf   :  { %v773_v43 = vpop.eup %772  ;;  %v493_v44 = vmul.f32 0.5, %v431_v38  ;;  %v436_v45 = vpop.f32.mrf.mxu1 }
 0x1d0   :  { %612 = vst [vmem:[#allocation2 + $0x38] sm:$0xff] %v580_v40  ;;  %v581_v46 = vadd.f32 0.5, %v549_v41  ;;  %v550_v47 = vmul.f32 0.5, %v773_v43  ;;  %v494_v48 = vmul.f32 0.5, %v433_v42  ;;  %v437_v49 = vadd.f32 %v436_v45, %v1128_v27 }
 0x1d1   :  { %786 = vtanh.f32 %v493_v44  ;;  %v438_v50 = vpop.f32.mrf.mxu1 }
 0x1d2   :  { %v775_v51 = vpop.eup %774  ;;  %613 = vst [vmem:[#allocation2 + $0x40] sm:$0xff] %v581_v46  ;;  %v582_v52 = vadd.f32 0.5, %v550_v47  ;;  %788 = vtanh.f32 %v494_v48  ;;  %v495_v53 = vmul.f32 0.5, %v437_v49  ;;  %v439_v54 = vadd.f32 %v438_v50, %v1130_v28 }
 0x1d3   :  { %v777_v55 = vpop.eup %776  ;;  %v551_v56 = vmul.f32 0.5, %v775_v51  ;;  %v442_v57 = vpop.f32.mrf.mxu1 }
 0x1d4   :  { %614 = vst [vmem:[#allocation2 + $0x48] sm:$0xff] %v582_v52  ;;  %v552_v58 = vmul.f32 0.5, %v777_v55  ;;  %790 = vtanh.f32 %v495_v53  ;;  %v496_v59 = vmul.f32 0.5, %v439_v54  ;;  %v443_v60 = vadd.f32 %v442_v57, %v1128_v27 }
 0x1d5   :  { %v779_v61 = vpop.eup %778  ;;  %v583_v62 = vadd.f32 0.5, %v551_v56  ;;  %v444_v63 = vpop.f32.mrf.mxu1 }
 0x1d6   :  { %v584_v0 = vadd.f32 0.5, %v552_v58  ;;  %v553_v1 = vmul.f32 0.5, %v779_v61  ;;  %792 = vtanh.f32 %v496_v59  ;;  %v497_v3 = vmul.f32 0.5, %v443_v60 }
 0x1d7   :  { %615 = vst [vmem:[#allocation2 + $0x50] sm:$0xff] %v583_v62  ;;  %v445_v5 = vadd.f32 %v444_v63, %v1130_v28  ;;  %v448_v6 = vpop.f32.mrf.mxu1 }
 0x1d8   :  { %v781_v7 = vpop.eup %780  ;;  %616 = vst [vmem:[#allocation2 + $0x58] sm:$0xff] %v584_v0  ;;  %v585_v8 = vadd.f32 0.5, %v553_v1  ;;  %794 = vtanh.f32 %v497_v3  ;;  %v449_v9 = vadd.f32 %v448_v6, %v1128_v27 }
 0x1d9   :  { %v783_v10 = vpop.eup %782  ;;  %v554_v11 = vmul.f32 0.5, %v781_v7  ;;  %v498_v12 = vmul.f32 0.5, %v445_v5  ;;  %v450_v13 = vpop.f32.mrf.mxu1 }
 0x1da   :  { %617 = vst [vmem:[#allocation2 + $0x60] sm:$0xff] %v585_v8  ;;  %v555_v14 = vmul.f32 0.5, %v783_v10  ;;  %v499_v15 = vmul.f32 0.5, %v449_v9  ;;  %v451_v16 = vadd.f32 %v450_v13, %v1130_v28 }
 0x1db   :  { %v785_v17 = vpop.eup %784  ;;  %v586_v18 = vadd.f32 0.5, %v554_v11  ;;  %796 = vtanh.f32 %v498_v12  ;;  %v454_v19 = vpop.f32.mrf.mxu1 }
 0x1dc   :  { %v587_v20 = vadd.f32 0.5, %v555_v14  ;;  %v556_v21 = vmul.f32 0.5, %v785_v17  ;;  %798 = vtanh.f32 %v499_v15  ;;  %v500_v22 = vmul.f32 0.5, %v451_v16 }
 0x1dd   :  { %618 = vst [vmem:[#allocation2 + $0x68] sm:$0xff] %v586_v18  ;;  %v455_v23 = vadd.f32 %v454_v19, %v1128_v27  ;;  %v456_v24 = vpop.f32.mrf.mxu1 }
 0x1de   :  { %v787_v25 = vpop.eup %786  ;;  %619 = vst [vmem:[#allocation2 + $0x70] sm:$0xff] %v587_v20  ;;  %v588_v26 = vadd.f32 0.5, %v556_v21  ;;  %800 = vtanh.f32 %v500_v22  ;;  %v457_v4 = vadd.f32 %v456_v24, %v1130_v28 }
 0x1df   :  { %v789_v29 = vpop.eup %788  ;;  %v557_v30 = vmul.f32 0.5, %v787_v25  ;;  %v501_v2 = vmul.f32 0.5, %v455_v23  ;;  %v460_v31 = vpop.f32.mrf.mxu1 }
 0x1e0   :  { %620 = vst [vmem:[#allocation2 + $0x78] sm:$0xff] %v588_v26  ;;  %v558_v32 = vmul.f32 0.5, %v789_v29  ;;  %v502_v33 = vmul.f32 0.5, %v457_v4  ;;  %v461_v34 = vadd.f32 %v460_v31, %v1128_v27 }
 0x1e1   :  { %v791_v35 = vpop.eup %790  ;;  %v589_v36 = vadd.f32 0.5, %v557_v30  ;;  %802 = vtanh.f32 %v501_v2  ;;  %v462_v37 = vpop.f32.mrf.mxu1 }
 0x1e2   :  { %v590_v38 = vadd.f32 0.5, %v558_v32  ;;  %v559_v39 = vmul.f32 0.5, %v791_v35  ;;  %804 = vtanh.f32 %v502_v33  ;;  %v503_v40 = vmul.f32 0.5, %v461_v34 }
 0x1e3   :  { %v793_v41 = vpop.eup %792  ;;  %621 = vst [vmem:[#allocation2 + $0x80] sm:$0xff] %v589_v36  ;;  %v463_v42 = vadd.f32 %v462_v37, %v1130_v28  ;;  %v466_v43 = vpop.f32.mrf.mxu1 }
 0x1e4   :  { %622 = vst [vmem:[#allocation2 + $0x88] sm:$0xff] %v590_v38  ;;  %v591_v44 = vadd.f32 0.5, %v559_v39  ;;  %v560_v45 = vmul.f32 0.5, %v793_v41  ;;  %806 = vtanh.f32 %v503_v40  ;;  %v467_v46 = vadd.f32 %v466_v43, %v1128_v27 }
 0x1e5   :  { %v795_v47 = vpop.eup %794  ;;  %v504_v48 = vmul.f32 0.5, %v463_v42  ;;  %v468_v49 = vpop.f32.mrf.mxu1 }
 0x1e6   :  { %623 = vst [vmem:[#allocation2 + $0x90] sm:$0xff] %v591_v44  ;;  %v592_v50 = vadd.f32 0.5, %v560_v45  ;;  %v561_v51 = vmul.f32 0.5, %v795_v47  ;;  %v505_v52 = vmul.f32 0.5, %v467_v46  ;;  %v469_v53 = vadd.f32 %v468_v49, %v1130_v28 }
 0x1e7   :  { %808 = vtanh.f32 %v504_v48  ;;  %v472_v54 = vpop.f32.mrf.mxu1 }
 0x1e8   :  { %v797_v55 = vpop.eup %796  ;;  %624 = vst [vmem:[#allocation2 + $0x98] sm:$0xff] %v592_v50  ;;  %v593_v56 = vadd.f32 0.5, %v561_v51  ;;  %810 = vtanh.f32 %v505_v52  ;;  %v506_v57 = vmul.f32 0.5, %v469_v53  ;;  %v473_v58 = vadd.f32 %v472_v54, %v1128_v27 }
 0x1e9   :  { %v799_v59 = vpop.eup %798  ;;  %v562_v60 = vmul.f32 0.5, %v797_v55  ;;  %v474_v61 = vpop.f32.mrf.mxu1 }
 0x1ea   :  { %625 = vst [vmem:[#allocation2 + $0xa0] sm:$0xff] %v593_v56  ;;  %v563_v62 = vmul.f32 0.5, %v799_v59  ;;  %812 = vtanh.f32 %v506_v57  ;;  %v507_v63 = vmul.f32 0.5, %v473_v58  ;;  %v475_v0 = vadd.f32 %v474_v61, %v1130_v28 }
 0x1eb   :  { %v801_v1 = vpop.eup %800  ;;  %v594_v3 = vadd.f32 0.5, %v562_v60 }
 0x1ec   :  { %v595_v5 = vadd.f32 0.5, %v563_v62  ;;  %v564_v6 = vmul.f32 0.5, %v801_v1  ;;  %814 = vtanh.f32 %v507_v63  ;;  %v508_v7 = vmul.f32 0.5, %v475_v0 }
 0x1ed   :  { %626 = vst [vmem:[#allocation2 + $0xa8] sm:$0xff] %v594_v3 }
 0x1ee   :  { %v803_v8 = vpop.eup %802  ;;  %627 = vst [vmem:[#allocation2 + $0xb0] sm:$0xff] %v595_v5  ;;  %v596_v9 = vadd.f32 0.5, %v564_v6  ;;  %816 = vtanh.f32 %v508_v7 }
 0x1ef   :  { %v805_v27 = vpop.eup %804  ;;  %v565_v10 = vmul.f32 0.5, %v803_v8 }
 0x1f0   :  { %628 = vst [vmem:[#allocation2 + $0xb8] sm:$0xff] %v596_v9  ;;  %v566_v11 = vmul.f32 0.5, %v805_v27 }
 0x1f1   :  { %v807_v12 = vpop.eup %806  ;;  %v597_v13 = vadd.f32 0.5, %v565_v10 }
 0x1f2   :  { %v598_v14 = vadd.f32 0.5, %v566_v11  ;;  %v567_v15 = vmul.f32 0.5, %v807_v12 }
 0x1f3   :  { %629 = vst [vmem:[#allocation2 + $0xc0] sm:$0xff] %v597_v13 }
 0x1f4   :  { %v809_v28 = vpop.eup %808  ;;  %630 = vst [vmem:[#allocation2 + $0xc8] sm:$0xff] %v598_v14  ;;  %v599_v16 = vadd.f32 0.5, %v567_v15 }
 0x1f5   :  { %v811_v17 = vpop.eup %810  ;;  %v568_v18 = vmul.f32 0.5, %v809_v28 }
 0x1f6   :  { %631 = vst [vmem:[#allocation2 + $0xd0] sm:$0xff] %v599_v16  ;;  %v569_v19 = vmul.f32 0.5, %v811_v17 }
 0x1f7   :  { %v813_v20 = vpop.eup %812  ;;  %v600_v21 = vadd.f32 0.5, %v568_v18 }
 0x1f8   :  { %v601_v22 = vadd.f32 0.5, %v569_v19  ;;  %v570_v23 = vmul.f32 0.5, %v813_v20 }
 0x1f9   :  { %v815_v24 = vpop.eup %814  ;;  %632 = vst [vmem:[#allocation2 + $0xd8] sm:$0xff] %v600_v21 }
 0x1fa   :  { %633 = vst [vmem:[#allocation2 + $0xe0] sm:$0xff] %v601_v22  ;;  %v602_v25 = vadd.f32 0.5, %v570_v23  ;;  %v571_v26 = vmul.f32 0.5, %v815_v24 }
 0x1fb   :  { %v817_v4 = vpop.eup %816 }
 0x1fc   :  { %634 = vst [vmem:[#allocation2 + $0xe8] sm:$0xff] %v602_v25  ;;  %v603_v29 = vadd.f32 0.5, %v571_v26  ;;  %v572_v30 = vmul.f32 0.5, %v817_v4 }
 0x1fe   :  { %635 = vst [vmem:[#allocation2 + $0xf0] sm:$0xff] %v603_v29  ;;  %v604_v2 = vadd.f32 0.5, %v572_v30 }
 0x200   :  { %636 = vst [vmem:[#allocation2 + $0xf8] sm:$0xff] %v604_v2 }
 0x201   :  { %829 = shalt.err (!%p826_p4)
}
 0x202   :  { %s842_s25 = smov 256   ;;  %s843_s26 = smov 16  }
 0x203   :  { %648 = dma.vmem_to_hbm [thread:$0]  %s643_s4, 4096, %s1172_s5, [#allocation3], %s842_s25, %s842_s25, %s843_s26  }
 0x204   :  { %838 = dma.done.wait [#allocation3], 4096  }
 0x205   :  { %839 = vsyncadd [#allocation3], 4294963200 }
 0x206   :  { %652 = vsyncpa [#allocation3], 1 }

</bundles_post_ra>
